<compile_context>
chip_gen: v5e
topology: v5e:2x2
jax: 0.10.0
libtpu: 0.0.40
codegen_flags: <defaults>
</compile_context>

<pallas_src>
import functools
import math

import jax
import jax.numpy as jnp
from jax.experimental import pallas as pl
from jax.experimental.pallas import tpu as pltpu

SCALES = (0.5, 1.0, 1.5, 2.0, 2.5)   # 5 scales -> conv1x1 in_ch = 5*out_ch + in_ch
EPS = 1e-5


# --------------------------- Pallas kernel ---------------------------------
def _msblock_kernel(xpad_ref, wms_ref, gms_ref, bms_ref, w1_ref, g1_ref, b1_ref,
                    out_ref, col_ref, cat_ref, *, B, L, Cin, Cms, Kmax, max_left):
    """Fused multi-scale conv + BN + SiLU + 1x1 conv + BN + SiLU.

    xpad_ref : (Cin, (L+Kmax-1)*B) bf16   padded input, lane index = pos*B + b
    wms_ref  : (Cms, Kmax*Cin)     bf16   fused zero-padded 5-scale conv weight
    gms/bms  : (Cms, 1)            f32    BN affine for the 5 conv branches
    w1_ref   : (Cout, Cms+Cin)     bf16   1x1 conv over [ms_0..ms_4, x]
    g1/b1    : (Cout, 1)           f32    BN affine for the projection
    out_ref  : (Cout, L*B)         f32    lane-dense output slab
    col_ref  : (Kmax*Cin, L*B)     bf16   im2col scratch
    cat_ref  : (Cms+Cin, L*B)      bf16   staged [silu(bn(ms)); x]
    """
    N = L * B
    xp = xpad_ref[...]                                   # single load of activations

    # im2col: tap k over ALL batches at once is one contiguous lane slice.
    # Kmax <= 10 here -> static unroll is fine.
    # TODO(synk): for large L, tile L on a parallel grid (megacore on v7x) with
    # a two-pass BatchNorm (per-tile partial sums + finalize); a single gridless
    # call is optimal at these shapes since BN stats couple all of B*L.
    for k in range(Kmax):
        col_ref[k * Cin:(k + 1) * Cin, :] = xp[:, k * B:k * B + N]

    # All 5 'SAME' convolutions as ONE bf16 MXU matmul (f32 accumulation).
    y = jnp.dot(wms_ref[...], col_ref[...],
                preferred_element_type=jnp.float32)      # (Cms, N)

    # BatchNorm1d (training mode, biased stats over B*L) + SiLU, single pass.
    inv_n = 1.0 / N
    mean = jnp.sum(y, axis=1, keepdims=True) * inv_n
    var = jnp.sum(y * y, axis=1, keepdims=True) * inv_n - mean * mean
    yn = (y - mean) * jax.lax.rsqrt(var + EPS) * gms_ref[...] + bms_ref[...]
    yact = yn * jax.nn.sigmoid(yn)                       # SiLU (EUP)

    # Stage [silu(bn(ms_0..ms_4)); x] in bf16 -> fused 1x1 projection, one dot.
    cat_ref[0:Cms, :] = yact.astype(jnp.bfloat16)
    cat_ref[Cms:Cms + Cin, :] = xp[:, max_left * B:max_left * B + N]   # x itself
    z = jnp.dot(w1_ref[...], cat_ref[...],
                preferred_element_type=jnp.float32)      # (Cout, N)

    zm = jnp.sum(z, axis=1, keepdims=True) * inv_n
    zv = jnp.sum(z * z, axis=1, keepdims=True) * inv_n - zm * zm
    zn = (z - zm) * jax.lax.rsqrt(zv + EPS) * g1_ref[...] + b1_ref[...]
    out_ref[...] = zn * jax.nn.sigmoid(zn)               # one lane-dense store


# --------------------------- host-side wrapper ------------------------------
def multi_scale_block_forward(x, params):
    wms, gms, bms, w1, g1, b1, Kmax, max_left, max_right = params
    B, Cin, L = x.shape
    Cout = w1.shape[0]
    Cms = wms.shape[0]
    N = L * B

    # Layout plumbing (host): batch interleaved on the lane axis (l*B + b) so
    # every conv tap is one contiguous lane slice and the output is one
    # lane-dense slab.  x is NOT passed separately; the kernel slices it out of
    # the padded slab (tap k == max_left).
    xt = jnp.transpose(x, (1, 2, 0))                           # (Cin, L, B)
    xpad = jnp.pad(xt, ((0, 0), (max_left, max_right), (0, 0)))
    xpad_flat = xpad.reshape(Cin, -1).astype(jnp.bfloat16)     # (Cin, (L+Kmax-1)*B)

    kernel = functools.partial(_msblock_kernel, B=B, L=L, Cin=Cin, Cms=Cms,
                               Kmax=Kmax, max_left=max_left)
    vmem = pl.BlockSpec(memory_space=pltpu.MemorySpace.VMEM)
    out_flat = pl.pallas_call(
        kernel,
        out_shape=jax.ShapeDtypeStruct((Cout, N), jnp.float32),
        in_specs=[vmem] * 7,
        out_specs=vmem,
        scratch_shapes=[
            pltpu.VMEM((Kmax * Cin, N), jnp.bfloat16),   # im2col
            pltpu.VMEM((Cms + Cin, N), jnp.bfloat16),    # [silu(bn(ms)); x]
        ],
    )(xpad_flat, wms, gms, bms, w1, g1, b1)

    # (Cout, L*B) lane-dense slab -> (B, Cout, L)
    return jnp.transpose(out_flat.reshape(Cout, L, B), (2, 0, 1))


def make_params(key, in_channels, out_channels, kernel_size):
    """Deterministic synthetic init matching MultiScaleBlock.__init__ shapes."""
    ksizes = [math.floor(kernel_size * s) for s in SCALES]
    Kmax = max(ksizes)
    max_left = (Kmax - 1) // 2
    max_right = Kmax - 1 - max_left
    keys = jax.random.split(key, 3 * len(SCALES) + 3)

    conv_ws, gammas, betas = [], [], []
    for i, K in enumerate(ksizes):
        fan_in = in_channels * K
        w = jax.random.normal(keys[3 * i], (out_channels, in_channels, K),
                              jnp.float32) / math.sqrt(fan_in)
        conv_ws.append(w)
        gammas.append(1.0 + 0.1 * jax.random.normal(
            keys[3 * i + 1], (out_channels,), jnp.float32))
        betas.append(0.1 * jax.random.normal(
            keys[3 * i + 2], (out_channels,), jnp.float32))

    Cms = len(SCALES) * out_channels
    # Pack all 5 SAME convs into one zero-padded (Kmax, Cin, Cms) weight,
    # then flatten+transpose to MXU-friendly (Cms, Kmax*Cin) bf16.
    wms = jnp.zeros((Kmax, in_channels, Cms), jnp.float32)
    for i, (K, w) in enumerate(zip(ksizes, conv_ws)):
        left = (K - 1) // 2
        start = max_left - left
        wms = wms.at[start:start + K, :,
                     i * out_channels:(i + 1) * out_channels].set(
            jnp.transpose(w, (2, 1, 0)))
    wms_k = jnp.transpose(wms.reshape(Kmax * in_channels, Cms)).astype(jnp.bfloat16)

    gms = jnp.concatenate(gammas).reshape(-1, 1)
    bms = jnp.concatenate(betas).reshape(-1, 1)

    # 1x1 conv weight: (Cout, 5*Cout + Cin); channel order = [ms convs..., x]
    w1 = jax.random.normal(keys[-3], (out_channels, Cms + in_channels),
                           jnp.float32) / math.sqrt(Cms + in_channels)
    g1 = (1.0 + 0.1 * jax.random.normal(keys[-2], (out_channels,),
                                        jnp.float32)).reshape(-1, 1)
    b1 = (0.1 * jax.random.normal(keys[-1], (out_channels,),
                                  jnp.float32)).reshape(-1, 1)

    kernel_params = (wms_k, gms, bms, w1.astype(jnp.bfloat16), g1, b1,
                     Kmax, max_left, max_right)
    ref_params = (conv_ws, gammas, betas, ksizes, w1, g1.reshape(-1),
                  b1.reshape(-1))
    return kernel_params, ref_params


# --------------------------- pure-JAX reference -----------------------------
def reference_forward(x, ref_params):
    """MultiScaleBlock.forward reference (training-mode BN).  Mirrors the
    kernel's numerics contract: bf16-rounded matmul/conv inputs, f32 math."""
    conv_ws, gammas, betas, ksizes, w1, g1, b1 = ref_params
    rnd = lambda a: a.astype(jnp.bfloat16).astype(jnp.float32)

    def bn_silu(y, g, bta):
        m = jnp.mean(y, axis=(0, 2), keepdims=True)
        v = jnp.mean((y - m) ** 2, axis=(0, 2), keepdims=True)
        yn = (y - m) * jax.lax.rsqrt(v + EPS) * g[None, :, None] + bta[None, :, None]
        return yn * jax.nn.sigmoid(yn)

    xr = rnd(x)
    ms = []
    for w, g, bta, K in zip(conv_ws, gammas, betas, ksizes):
        left = (K - 1) // 2
        right = K - 1 - left
        xp = jnp.pad(xr, ((0, 0), (0, 0), (left, right)))
        y = jax.lax.conv_general_dilated(
            xp, rnd(w), (1,), 'VALID', dimension_numbers=('NCH', 'OIH', 'NCH'))
        ms.append(bn_silu(y, g, bta))
    cat = rnd(jnp.concatenate(ms + [xr], axis=1))
    z = jnp.einsum('oc,bcl->bol', rnd(w1), cat)
    return bn_silu(z, g1, b1)


# --------------------------------- main --------------------------------------
if __name__ == "__main__":
    B, in_channels, out_channels, kernel_size, L = 2, 4, 8, 4, 16

    key = jax.random.PRNGKey(0)
    kx, kp = jax.random.split(key)
    x = jax.random.normal(kx, (B, in_channels, L), jnp.float32)

    kernel_params, ref_params = make_params(kp, in_channels, out_channels,
                                            kernel_size)

    out = multi_scale_block_forward(x, kernel_params)
    out = jax.block_until_ready(out)

    ref = reference_forward(x, ref_params)
    assert out.shape == (B, out_channels, L)
    err = jnp.max(jnp.abs(out - ref))
    assert jnp.allclose(out, ref, atol=2e-3, rtol=2e-3), f"max err {err}"

    print("KERNEL_OK")
</pallas_src>

<mosaic_0001>
module attributes {stable_mosaic.version = 11 : i64} {
  func.func @_msblock_kernel(%arg0: memref<4x50xbf16, #tpu.memory_space<vmem>>, %arg1: memref<40x40xbf16, #tpu.memory_space<vmem>>, %arg2: memref<40x1xf32, #tpu.memory_space<vmem>>, %arg3: memref<40x1xf32, #tpu.memory_space<vmem>>, %arg4: memref<8x44xbf16, #tpu.memory_space<vmem>>, %arg5: memref<8x1xf32, #tpu.memory_space<vmem>>, %arg6: memref<8x1xf32, #tpu.memory_space<vmem>>, %arg7: memref<8x32xf32, #tpu.memory_space<vmem>>, %arg8: memref<40x32xbf16, #tpu.memory_space<vmem>>, %arg9: memref<44x32xbf16, #tpu.memory_space<vmem>>) attributes {dimension_semantics = [], scalar_prefetch = 0 : i64, scratch_operands = 2 : i64, tpu.core_type = #tpu.core_type<tc>} {
    %c0 = arith.constant 0 : index
    %c0_0 = arith.constant 0 : index
    %0 = vector.load %arg0[%c0, %c0_0] : memref<4x50xbf16, #tpu.memory_space<vmem>>, vector<4x50xbf16>
    %1 = vector.extract_strided_slice %0 {offsets = [0, 0], sizes = [4, 32], strides = [1, 1]} : vector<4x50xbf16> to vector<4x32xbf16>
    %c0_1 = arith.constant 0 : index
    %c0_2 = arith.constant 0 : index
    %2 = vector.load %arg8[%c0_1, %c0_2] : memref<40x32xbf16, #tpu.memory_space<vmem>>, vector<4x32xbf16>
    tpu.vector_store %arg8[%c0_1, %c0_2], %1 {strides = array<i32>} : memref<40x32xbf16, #tpu.memory_space<vmem>>, vector<4x32xbf16>,
    %3 = vector.extract_strided_slice %0 {offsets = [0, 2], sizes = [4, 32], strides = [1, 1]} : vector<4x50xbf16> to vector<4x32xbf16>
    %c4 = arith.constant 4 : index
    %c0_3 = arith.constant 0 : index
    %4 = vector.load %arg8[%c4, %c0_3] : memref<40x32xbf16, #tpu.memory_space<vmem>>, vector<4x32xbf16>
    tpu.vector_store %arg8[%c4, %c0_3], %3 {strides = array<i32>} : memref<40x32xbf16, #tpu.memory_space<vmem>>, vector<4x32xbf16>,
    %5 = vector.extract_strided_slice %0 {offsets = [0, 4], sizes = [4, 32], strides = [1, 1]} : vector<4x50xbf16> to vector<4x32xbf16>
    %c8 = arith.constant 8 : index
    %c0_4 = arith.constant 0 : index
    %6 = vector.load %arg8[%c8, %c0_4] : memref<40x32xbf16, #tpu.memory_space<vmem>>, vector<4x32xbf16>
    tpu.vector_store %arg8[%c8, %c0_4], %5 {strides = array<i32>} : memref<40x32xbf16, #tpu.memory_space<vmem>>, vector<4x32xbf16>,
    %7 = vector.extract_strided_slice %0 {offsets = [0, 6], sizes = [4, 32], strides = [1, 1]} : vector<4x50xbf16> to vector<4x32xbf16>
    %c12 = arith.constant 12 : index
    %c0_5 = arith.constant 0 : index
    %8 = vector.load %arg8[%c12, %c0_5] : memref<40x32xbf16, #tpu.memory_space<vmem>>, vector<4x32xbf16>
    tpu.vector_store %arg8[%c12, %c0_5], %7 {strides = array<i32>} : memref<40x32xbf16, #tpu.memory_space<vmem>>, vector<4x32xbf16>,
    %9 = vector.extract_strided_slice %0 {offsets = [0, 8], sizes = [4, 32], strides = [1, 1]} : vector<4x50xbf16> to vector<4x32xbf16>
    %c16 = arith.constant 16 : index
    %c0_6 = arith.constant 0 : index
    %10 = vector.load %arg8[%c16, %c0_6] : memref<40x32xbf16, #tpu.memory_space<vmem>>, vector<4x32xbf16>
    tpu.vector_store %arg8[%c16, %c0_6], %9 {strides = array<i32>} : memref<40x32xbf16, #tpu.memory_space<vmem>>, vector<4x32xbf16>,
    %11 = vector.extract_strided_slice %0 {offsets = [0, 10], sizes = [4, 32], strides = [1, 1]} : vector<4x50xbf16> to vector<4x32xbf16>
    %c20 = arith.constant 20 : index
    %c0_7 = arith.constant 0 : index
    %12 = vector.load %arg8[%c20, %c0_7] : memref<40x32xbf16, #tpu.memory_space<vmem>>, vector<4x32xbf16>
    tpu.vector_store %arg8[%c20, %c0_7], %11 {strides = array<i32>} : memref<40x32xbf16, #tpu.memory_space<vmem>>, vector<4x32xbf16>,
    %13 = vector.extract_strided_slice %0 {offsets = [0, 12], sizes = [4, 32], strides = [1, 1]} : vector<4x50xbf16> to vector<4x32xbf16>
    %c24 = arith.constant 24 : index
    %c0_8 = arith.constant 0 : index
    %14 = vector.load %arg8[%c24, %c0_8] : memref<40x32xbf16, #tpu.memory_space<vmem>>, vector<4x32xbf16>
    tpu.vector_store %arg8[%c24, %c0_8], %13 {strides = array<i32>} : memref<40x32xbf16, #tpu.memory_space<vmem>>, vector<4x32xbf16>,
    %15 = vector.extract_strided_slice %0 {offsets = [0, 14], sizes = [4, 32], strides = [1, 1]} : vector<4x50xbf16> to vector<4x32xbf16>
    %c28 = arith.constant 28 : index
    %c0_9 = arith.constant 0 : index
    %16 = vector.load %arg8[%c28, %c0_9] : memref<40x32xbf16, #tpu.memory_space<vmem>>, vector<4x32xbf16>
    tpu.vector_store %arg8[%c28, %c0_9], %15 {strides = array<i32>} : memref<40x32xbf16, #tpu.memory_space<vmem>>, vector<4x32xbf16>,
    %17 = vector.extract_strided_slice %0 {offsets = [0, 16], sizes = [4, 32], strides = [1, 1]} : vector<4x50xbf16> to vector<4x32xbf16>
    %c32 = arith.constant 32 : index
    %c0_10 = arith.constant 0 : index
    %18 = vector.load %arg8[%c32, %c0_10] : memref<40x32xbf16, #tpu.memory_space<vmem>>, vector<4x32xbf16>
    tpu.vector_store %arg8[%c32, %c0_10], %17 {strides = array<i32>} : memref<40x32xbf16, #tpu.memory_space<vmem>>, vector<4x32xbf16>,
    %19 = vector.extract_strided_slice %0 {offsets = [0, 18], sizes = [4, 32], strides = [1, 1]} : vector<4x50xbf16> to vector<4x32xbf16>
    %c36 = arith.constant 36 : index
    %c0_11 = arith.constant 0 : index
    %20 = vector.load %arg8[%c36, %c0_11] : memref<40x32xbf16, #tpu.memory_space<vmem>>, vector<4x32xbf16>
    tpu.vector_store %arg8[%c36, %c0_11], %19 {strides = array<i32>} : memref<40x32xbf16, #tpu.memory_space<vmem>>, vector<4x32xbf16>,
    %c0_12 = arith.constant 0 : index
    %c0_13 = arith.constant 0 : index
    %21 = vector.load %arg1[%c0_12, %c0_13] : memref<40x40xbf16, #tpu.memory_space<vmem>>, vector<40x40xbf16>
    %c0_14 = arith.constant 0 : index
    %c0_15 = arith.constant 0 : index
    %22 = vector.load %arg8[%c0_14, %c0_15] : memref<40x32xbf16, #tpu.memory_space<vmem>>, vector<40x32xbf16>
    %cst = arith.constant dense<0.000000e+00> : vector<40x32xf32>
    %23 = tpu.matmul %21, %22, %cst {dimension_numbers = #tpu.dot_dimension_numbers<[1], [0], [0], [1], [0, 0, 1, 1], [], []>} : vector<40x40xbf16>, vector<40x32xbf16>, vector<40x32xf32> -> vector<40x32xf32>
    %cst_16 = arith.constant dense<0.000000e+00> : vector<40xf32>
    %24 = vector.multi_reduction <add>, %23, %cst_16 [1] : vector<40x32xf32> to vector<40xf32>
    %25 = vector.shape_cast %24 : vector<40xf32> to vector<40x1xf32>
    %cst_17 = arith.constant 3.125000e-02 : f32
    %26 = vector.broadcast %cst_17 : f32 to vector<40x1xf32>
    %27 = arith.mulf %25, %26 : vector<40x1xf32>
    %28 = arith.mulf %23, %23 : vector<40x32xf32>
    %cst_18 = arith.constant dense<0.000000e+00> : vector<40xf32>
    %29 = vector.multi_reduction <add>, %28, %cst_18 [1] : vector<40x32xf32> to vector<40xf32>
    %30 = vector.shape_cast %29 : vector<40xf32> to vector<40x1xf32>
    %cst_19 = arith.constant 3.125000e-02 : f32
    %31 = vector.broadcast %cst_19 : f32 to vector<40x1xf32>
    %32 = arith.mulf %30, %31 : vector<40x1xf32>
    %33 = arith.mulf %27, %27 : vector<40x1xf32>
    %34 = arith.subf %32, %33 : vector<40x1xf32>
    %35 = vector.broadcast %27 : vector<40x1xf32> to vector<40x32xf32>
    %36 = arith.subf %23, %35 : vector<40x32xf32>
    %cst_20 = arith.constant 9.99999974E-6 : f32
    %37 = vector.broadcast %cst_20 : f32 to vector<40x1xf32>
    %38 = arith.addf %34, %37 : vector<40x1xf32>
    %39 = math.rsqrt %38 : vector<40x1xf32>
    %40 = vector.broadcast %39 : vector<40x1xf32> to vector<40x32xf32>
    %41 = arith.mulf %36, %40 : vector<40x32xf32>
    %c0_21 = arith.constant 0 : index
    %c0_22 = arith.constant 0 : index
    %42 = vector.load %arg2[%c0_21, %c0_22] : memref<40x1xf32, #tpu.memory_space<vmem>>, vector<40x1xf32>
    %43 = vector.broadcast %42 : vector<40x1xf32> to vector<40x32xf32>
    %44 = arith.mulf %41, %43 : vector<40x32xf32>
    %c0_23 = arith.constant 0 : index
    %c0_24 = arith.constant 0 : index
    %45 = vector.load %arg3[%c0_23, %c0_24] : memref<40x1xf32, #tpu.memory_space<vmem>>, vector<40x1xf32>
    %46 = vector.broadcast %45 : vector<40x1xf32> to vector<40x32xf32>
    %47 = arith.addf %44, %46 : vector<40x32xf32>
    %48 = arith.negf %47 : vector<40x32xf32>
    %49 = math.exp %48 : vector<40x32xf32>
    %cst_25 = arith.constant 1.000000e+00 : f32
    %50 = vector.broadcast %cst_25 : f32 to vector<40x32xf32>
    %51 = arith.addf %50, %49 : vector<40x32xf32>
    %52 = arith.divf %50, %51 : vector<40x32xf32>
    %53 = arith.mulf %47, %52 : vector<40x32xf32>
    %54 = arith.truncf %53 : vector<40x32xf32> to vector<40x32xbf16>
    %c0_26 = arith.constant 0 : index
    %c0_27 = arith.constant 0 : index
    %55 = vector.load %arg9[%c0_26, %c0_27] : memref<44x32xbf16, #tpu.memory_space<vmem>>, vector<40x32xbf16>
    tpu.vector_store %arg9[%c0_26, %c0_27], %54 {strides = array<i32>} : memref<44x32xbf16, #tpu.memory_space<vmem>>, vector<40x32xbf16>,
    %56 = vector.extract_strided_slice %0 {offsets = [0, 8], sizes = [4, 32], strides = [1, 1]} : vector<4x50xbf16> to vector<4x32xbf16>
    %c40 = arith.constant 40 : index
    %c0_28 = arith.constant 0 : index
    %57 = vector.load %arg9[%c40, %c0_28] : memref<44x32xbf16, #tpu.memory_space<vmem>>, vector<4x32xbf16>
    tpu.vector_store %arg9[%c40, %c0_28], %56 {strides = array<i32>} : memref<44x32xbf16, #tpu.memory_space<vmem>>, vector<4x32xbf16>,
    %c0_29 = arith.constant 0 : index
    %c0_30 = arith.constant 0 : index
    %58 = vector.load %arg4[%c0_29, %c0_30] : memref<8x44xbf16, #tpu.memory_space<vmem>>, vector<8x44xbf16>
    %c0_31 = arith.constant 0 : index
    %c0_32 = arith.constant 0 : index
    %59 = vector.load %arg9[%c0_31, %c0_32] : memref<44x32xbf16, #tpu.memory_space<vmem>>, vector<44x32xbf16>
    %cst_33 = arith.constant dense<0.000000e+00> : vector<8x32xf32>
    %60 = tpu.matmul %58, %59, %cst_33 {dimension_numbers = #tpu.dot_dimension_numbers<[1], [0], [0], [1], [0, 0, 1, 1], [], []>} : vector<8x44xbf16>, vector<44x32xbf16>, vector<8x32xf32> -> vector<8x32xf32>
    %cst_34 = arith.constant dense<0.000000e+00> : vector<8xf32>
    %61 = vector.multi_reduction <add>, %60, %cst_34 [1] : vector<8x32xf32> to vector<8xf32>
    %62 = vector.shape_cast %61 : vector<8xf32> to vector<8x1xf32>
    %cst_35 = arith.constant 3.125000e-02 : f32
    %63 = vector.broadcast %cst_35 : f32 to vector<8x1xf32>
    %64 = arith.mulf %62, %63 : vector<8x1xf32>
    %65 = arith.mulf %60, %60 : vector<8x32xf32>
    %cst_36 = arith.constant dense<0.000000e+00> : vector<8xf32>
    %66 = vector.multi_reduction <add>, %65, %cst_36 [1] : vector<8x32xf32> to vector<8xf32>
    %67 = vector.shape_cast %66 : vector<8xf32> to vector<8x1xf32>
    %cst_37 = arith.constant 3.125000e-02 : f32
    %68 = vector.broadcast %cst_37 : f32 to vector<8x1xf32>
    %69 = arith.mulf %67, %68 : vector<8x1xf32>
    %70 = arith.mulf %64, %64 : vector<8x1xf32>
    %71 = arith.subf %69, %70 : vector<8x1xf32>
    %72 = vector.broadcast %64 : vector<8x1xf32> to vector<8x32xf32>
    %73 = arith.subf %60, %72 : vector<8x32xf32>
    %cst_38 = arith.constant 9.99999974E-6 : f32
    %74 = vector.broadcast %cst_38 : f32 to vector<8x1xf32>
    %75 = arith.addf %71, %74 : vector<8x1xf32>
    %76 = math.rsqrt %75 : vector<8x1xf32>
    %77 = vector.broadcast %76 : vector<8x1xf32> to vector<8x32xf32>
    %78 = arith.mulf %73, %77 : vector<8x32xf32>
    %c0_39 = arith.constant 0 : index
    %c0_40 = arith.constant 0 : index
    %79 = vector.load %arg5[%c0_39, %c0_40] : memref<8x1xf32, #tpu.memory_space<vmem>>, vector<8x1xf32>
    %80 = vector.broadcast %79 : vector<8x1xf32> to vector<8x32xf32>
    %81 = arith.mulf %78, %80 : vector<8x32xf32>
    %c0_41 = arith.constant 0 : index
    %c0_42 = arith.constant 0 : index
    %82 = vector.load %arg6[%c0_41, %c0_42] : memref<8x1xf32, #tpu.memory_space<vmem>>, vector<8x1xf32>
    %83 = vector.broadcast %82 : vector<8x1xf32> to vector<8x32xf32>
    %84 = arith.addf %81, %83 : vector<8x32xf32>
    %85 = arith.negf %84 : vector<8x32xf32>
    %86 = math.exp %85 : vector<8x32xf32>
    %cst_43 = arith.constant 1.000000e+00 : f32
    %87 = vector.broadcast %cst_43 : f32 to vector<8x32xf32>
    %88 = arith.addf %87, %86 : vector<8x32xf32>
    %89 = arith.divf %87, %88 : vector<8x32xf32>
    %90 = arith.mulf %84, %89 : vector<8x32xf32>
    %c0_44 = arith.constant 0 : index
    %c0_45 = arith.constant 0 : index
    %91 = vector.load %arg7[%c0_44, %c0_45] : memref<8x32xf32, #tpu.memory_space<vmem>>, vector<8x32xf32>
    tpu.vector_store %arg7[%c0_44, %c0_45], %90 {strides = array<i32>} : memref<8x32xf32, #tpu.memory_space<vmem>>, vector<8x32xf32>,
    return
  }
}

</mosaic_0001>

<bundles_post_ra>
// kernel: tpu_custom_call.1
= control target key start
LH: loop header
LB: loop body
LE: loop exit
PB: predicated region body
PF: predicated region fallthrough
CT: control target
= control target key end

     0   :  { %s967_s0 = inlined_call_operand.vmem [shape: bf16[4,50], index: 0, kind: input, shape index: {}]   ;;  %s968_s1 = inlined_call_operand.vmem [shape: bf16[40,40], index: 1, kind: input, shape index: {}]   ;;  %s969_s2 = inlined_call_operand.vmem [shape: f32[40,1], index: 2, kind: input, shape index: {}]   ;;  %s970_s3 = inlined_call_operand.vmem [shape: f32[40,1], index: 3, kind: input, shape index: {}]   ;;  %s971_s4 = inlined_call_operand.vmem [shape: bf16[8,44], index: 4, kind: input, shape index: {}]   ;;  %s972_s5 = inlined_call_operand.vmem [shape: f32[8,1], index: 5, kind: input, shape index: {}]   ;;  %s973_s6 = inlined_call_operand.vmem [shape: f32[8,1], index: 6, kind: input, shape index: {}]   ;;  %s974_s7 = inlined_call_operand.hbm [shape: f32[8,32], index: 7, kind: output, shape index: {}]  }
   0x1   :  { %v28_v0 = vld [vmem:[%s967_s0] sm:$0x3] }
   0x2   :  { %12 = vsyncpa [#allocation5], 0  ;;  %33 = vst [vmem:[#allocation1 + $0x1] ss:$2 sm:$0xff] %v28_v0  ;;  %s732_s26 = smov 120   ;;  %s733_s27 = smov 118  }
   0x3   :  { %s734_s0 = smov 124   ;;  %s735_s28 = smov 116   ;;  %vm29_vm0 = vcmask 254976   ;;  %vm39_vm1 = vcmask 257026   ;;  %v299_v17 = vld [vmem:[%s969_s2 + $0x10] sm:$0xff]  ;;  %v336_v18 = vld [vmem:[%s970_s3 + $0x20] sm:$0xff] }
   0x4   :  { %30 = vst.msk [vmem:[#allocation2] sm:$0x3] %vm29_vm0, %v28_v0  ;;  %s736_s29 = smov 114   ;;  %s737_s30 = smov 112   ;;  %v741_v19 = vmov 0   ;;  %v301_v20 = vld [vmem:[%s969_s2 + $0x20] sm:$0xff] }
   0x5   :  { %s738_s8 = smov 122   ;;  %s739_s9 = smov 110   ;;  %669 = vset.pattern.permute.xlu2 %v741_v19  ;;  %668 = vset.pattern.permute.xlu1 %v741_v19  ;;  %v334_v22 = vld [vmem:[%s970_s3 + $0x10] sm:$0xff]  ;;  %v300_v23 = vld [vmem:[%s969_s2 + $0x18] sm:$0xff]  ;;  %v297_v27 = vld [vmem:[%s969_s2] sm:$0xff]  ;;  %vm149_vm2 = vcmask 1043456  }
   0x6   :  { %s740_s10 = smov 126   ;;  %667 = vset.pattern.permute.xlu0 %v741_v19  ;;  %v335_v28 = vld [vmem:[%s970_s3 + $0x18] sm:$0xff]  ;;  %v105_v31 = vld [vmem:[%s968_s1 + $0x10] sm:$0xf]  ;;  %v643_v35 = vld [vmem:[%s968_s1] sm:$0xff]  ;;  %vm139_vm3 = vcmask 326656  }
   0x7   :  { %v120_v34 = vunpack.c.l.b16 %v105_v31  ;;  %v644_v36 = vld [vmem:[%s968_s1 + $0x8] sm:$0xff]  ;;  %vm176_vm4 = vcmask 261120   ;;  %v332_v60 = vld [vmem:[%s970_s3] sm:$0xff]  ;;  %s596_s17 = sshll.u32 %s974_s7, 4  ;;  %s597_s17 = int_to_ptr.hbm [resolvable:$true] %s596_s17 }
   0x8   :  { %v298_v59 = vld [vmem:[%s969_s2 + $0x8] sm:$0xff]  ;;  %v554_v63 = vld [vmem:[%s972_s5] sm:$0xff] }
   0x9   :  { %v34_v1 = vld.sshfl [vmem:[#allocation1] sm:$0xff pattern:$0x75643120]  ;;  %v123_v37 = vpack.c.b16 %v120_v34, %v120_v34  ;;  %v333_v61 = vld [vmem:[%s970_s3 + $0x8] sm:$0xff] }
   0xa   :  { %41 = vst [vmem:[#allocation1] ss:$2 sm:$0xff] %v28_v0 }
  0x11   :  { %v42_v2 = vld.sshfl [vmem:[#allocation1] sm:$0xff pattern:$0x75643120] }
  0x12   :  { %49 = vst [vmem:[#allocation1 + $0x1] ss:$2 sm:$0xff] %v28_v0 }
  0x19   :  { %v50_v3 = vld.sshfl [vmem:[#allocation1] sm:$0xff pattern:$0x75643120] }
  0x1a   :  { %56 = vst [vmem:[#allocation1] ss:$2 sm:$0xff] %v28_v0 }
  0x21   :  { %v57_v4 = vld.sshfl [vmem:[#allocation1] sm:$0xff pattern:$0x75643120] }
  0x22   :  { %59 = vrot.lane.b32.xlu1 %v57_v4, %s732_s26  ;;  %64 = vst [vmem:[#allocation1 + $0x1] ss:$2 sm:$0xff] %v28_v0 }
  0x29   :  { %v65_v5 = vld.sshfl [vmem:[#allocation1] sm:$0xff pattern:$0x75643120] }
  0x2a   :  { %71 = vst [vmem:[#allocation1] ss:$2 sm:$0xff] %v28_v0  ;;  %67 = vrot.lane.b32.xlu1 %v65_v5, %s733_s27 }
  0x31   :  { %v72_v6 = vld.sshfl [vmem:[#allocation1] sm:$0xff pattern:$0x75643120] }
  0x32   :  { %79 = vst [vmem:[#allocation1 + $0x1] ss:$2 sm:$0xff] %v28_v0  ;;  %44 = vrot.lane.b32.xlu1 %v42_v2, %s734_s0  ;;  %74 = vrot.lane.b32.xlu2 %v72_v6, %s735_s28 }
  0x39   :  { %v80_v7 = vld.sshfl [vmem:[#allocation1] sm:$0xff pattern:$0x75643120] }
  0x3a   :  { %86 = vst [vmem:[#allocation1] ss:$2 sm:$0xff] %v28_v0  ;;  %82 = vrot.lane.b32.xlu2 %v80_v7, %s736_s29  ;;  %359 = vperm.xlu1 %668, %v336_v18  }
  0x41   :  { %v87_v8 = vld.sshfl [vmem:[#allocation1] sm:$0xff pattern:$0x75643120] }
  0x42   :  { %89 = vrot.lane.b32.xlu0 %v87_v8, %s737_s30  ;;  %94 = vst [vmem:[#allocation1 + $0x1] ss:$2 sm:$0xff] %v28_v0  ;;  %52 = vrot.lane.b32.xlu2 %v50_v3, %s738_s8 }
  0x43   :  { %319 = vperm.xlu1 %668, %v300_v23  }
  0x49   :  { %v95_v9 = vld.sshfl [vmem:[#allocation1] sm:$0xff pattern:$0x75643120] }
  0x4a   :  { %97 = vrot.lane.b32.xlu0 %v95_v9, %s739_s9  ;;  %478 = vst [vmem:[#allocation1] ss:$2 sm:$0xff] %v28_v0  ;;  %314 = vperm.xlu2 %669, %v299_v17   ;;  %v561_v0 = vld [vmem:[%s973_s6] sm:$0xff] }
  0x4b   :  { %354 = vperm.xlu1 %668, %v335_v28  }
  0x51   :  { %v479_v62 = vld.sshfl [vmem:[#allocation1] sm:$0xff pattern:$0x75643120] }
  0x52   :  { %36 = vrot.lane.b32.xlu0 %v34_v1, %s740_s10  ;;  %349 = vperm.xlu2 %669, %v334_v22  }
  0x5a   :  { %324 = vperm.xlu0 %667, %v301_v20   ;;  %304 = vperm.xlu2 %669, %v297_v27  }
  0x8c   :  { %v75_v10 = vpop.permute.xlu2 %74 }
  0x8d   :  { %77 = vst.msk [vmem:[#allocation2 + $0xc] sm:$0x3] %vm29_vm0, %v75_v10 }
  0x94   :  { %v60_v11 = vpop.permute.xlu1 %59  ;;  %v83_v12 = vpop.permute.xlu2 %82 }
  0x95   :  { %62 = vst.msk [vmem:[#allocation2 + $0x8] sm:$0x3] %vm29_vm0, %v60_v11 }
  0x96   :  { %85 = vst.msk [vmem:[#allocation2 + $0xc] sm:$0xc] %vm39_vm1, %v83_v12 }
  0x9c   :  { %v68_v13 = vpop.permute.xlu1 %67  ;;  %v53_v14 = vpop.permute.xlu2 %52 }
  0x9d   :  { %70 = vst.msk [vmem:[#allocation2 + $0x8] sm:$0xc] %vm39_vm1, %v68_v13 }
  0x9e   :  { %55 = vst.msk [vmem:[#allocation2 + $0x4] sm:$0xc] %vm39_vm1, %v53_v14 }
  0xa4   :  { %v45_v15 = vpop.permute.xlu1 %44  ;;  %v646_v32 = vld [vmem:[#allocation2 + $0x8] sm:$0xff]  ;;  %v878_v1 = vpop.permute.xlu2 %314 }
  0xa5   :  { %47 = vst.msk [vmem:[#allocation2 + $0x4] sm:$0x3] %vm29_vm0, %v45_v15 }
  0xac   :  { %v880_v2 = vpop.permute.xlu1 %359  ;;  %v882_v3 = vpop.permute.xlu2 %349 }
  0xb4   :  { %v90_v16 = vpop.permute.xlu0 %89  ;;  %v886_v5 = vpop.permute.xlu2 %304 }
  0xb5   :  { %92 = vst.msk [vmem:[#allocation2 + $0x10] sm:$0x3] %vm29_vm0, %v90_v16  ;;  %v884_v4 = vpop.permute.xlu1 %319 }
  0xbc   :  { %v98_v21 = vpop.permute.xlu0 %97 }
  0xbd   :  { %100 = vst.msk [vmem:[#allocation2 + $0x10] sm:$0xc] %vm39_vm1, %v98_v21  ;;  %v888_v6 = vpop.permute.xlu1 %354 }
  0xc4   :  { %v37_v24 = vpop.permute.xlu0 %36  ;;  %v110_v25 = vld [vmem:[#allocation2 + $0x10] sm:$0xf] }
  0xc5   :  { %40 = vst.msk [vmem:[#allocation2] sm:$0xc] %vm39_vm1, %v37_v24  ;;  %v133_v26 = vunpack.c.l.b16 %v110_v25 }
  0xc7   :  { %v136_v29 = vpack.c.b16 %v133_v26, %v133_v26 }
  0xc9   :  { %v151_v30 = vsel %vm149_vm2, %v136_v29, 0 }
  0xca   :  { %158 = vmatpush.bf16.msra.mxu0 %v151_v30  ;;  %650 = vmatpush.bf16.msra.mxu2 %v151_v30 }
  0xcb   :  { %651 = vmatpush.bf16.msra.mxu3 %v151_v30 }
  0xcc   :  { %v645_v33 = vld [vmem:[#allocation2] sm:$0xff]  ;;  %v890_v7 = vpop.permute.xlu0 %324 }
  0xce   :  { %159 = vmatpush.bf16.msra.mxu0 %v646_v32  ;;  %652 = vmatpush.bf16.msra.mxu2 %v646_v32 }
  0xcf   :  { %653 = vmatpush.bf16.msra.mxu3 %v646_v32 }
  0xd2   :  { %160 = vmatpush.bf16.msra.mxu0 %v645_v33  ;;  %654 = vmatpush.bf16.msra.mxu2 %v645_v33 }
  0xd3   :  { %655 = vmatpush.bf16.msra.mxu3 %v645_v33 }
  0xd5   :  { %621 = vmatmul.msk.bf16.vlgmr.msra.gmra.mxu0 %vm139_vm3, %v643_v35  ;;  %622 = vmatmul.msk.bf16.vlgmr.msra.gmra.mxu2 %vm139_vm3, %v644_v36 }
  0xd6   :  { %623 = vmatmul.msk.bf16.vlgmr.msra.gmra.mxu3 %vm139_vm3, %v123_v37 }
 0x152   :  { %v827_v38 = vpop.f32.mrf.mxu0 }
 0x153   :  { %v177_v39 = vsel %vm176_vm4, %v827_v38, 0.0  ;;  %v197_v40 = vmul.f32 %v827_v38, %v827_v38 }
 0x154   :  { %178 = vadd.xlane.f32.xlu2 %v177_v39 }
 0x155   :  { %v202_v41 = vsel %vm176_vm4, %v197_v40, 0.0 }
 0x156   :  { %203 = vadd.xlane.f32.xlu1 %v202_v41 }
 0x158   :  { %v834_v42 = vpop.f32.mrf.mxu2 }
 0x159   :  { %v836_v43 = vpop.f32.mrf.mxu3  ;;  %v183_v44 = vsel %vm176_vm4, %v834_v42, 0.0  ;;  %v199_v49 = vmul.f32 %v834_v42, %v834_v42 }
 0x15a   :  { %v189_v45 = vsel %vm176_vm4, %v836_v43, 0.0  ;;  %v201_v46 = vmul.f32 %v836_v43, %v836_v43  ;;  %v844_v47 = vpop.f32.mrf.mxu0 }
 0x15b   :  { %190 = vadd.xlane.f32.xlu0 %v189_v45  ;;  %v198_v50 = vmul.f32 %v844_v47, %v844_v47  ;;  %v208_v54 = vsel %vm176_vm4, %v199_v49, 0.0  ;;  %v180_v57 = vsel %vm176_vm4, %v844_v47, 0.0 }
 0x15c   :  { %184 = vadd.xlane.f32.xlu2 %v183_v44  ;;  %v214_v48 = vsel %vm176_vm4, %v201_v46, 0.0 }
 0x15d   :  { %v205_v55 = vsel %vm176_vm4, %v198_v50, 0.0 }
 0x15e   :  { %215 = vadd.xlane.f32.xlu1 %v214_v48 }
 0x160   :  { %v851_v51 = vpop.f32.mrf.mxu2 }
 0x161   :  { %v200_v52 = vmul.f32 %v851_v51, %v851_v51  ;;  %v174_v53 = vpop.f32.mrf.mxu3  ;;  %v186_v58 = vsel %vm176_vm4, %v851_v51, 0.0 }
 0x163   :  { %209 = vadd.xlane.f32.xlu0 %v208_v54  ;;  %v211_v56 = vsel %vm176_vm4, %v200_v52, 0.0 }
 0x164   :  { %206 = vadd.xlane.f32.xlu2 %v205_v55 }
 0x166   :  { %212 = vadd.xlane.f32.xlu1 %v211_v56 }
 0x16b   :  { %181 = vadd.xlane.f32.xlu0 %v180_v57 }
 0x16c   :  { %187 = vadd.xlane.f32.xlu2 %v186_v58 }
 0x17f   :  { %309 = vperm.xlu0 %667, %v298_v59   ;;  %339 = vperm.xlu1 %668, %v332_v60  }
 0x184   :  { %344 = vperm.xlu2 %669, %v333_v61  }
 0x187   :  { %481 = vrot.lane.b32.xlu0 %v479_v62, %s732_s26 }
 0x18f   :  { %557 = vperm.xlu0 %667, %v554_v63  }
 0x197   :  { %564 = vperm.xlu0 %667, %v561_v0  }
 0x1c7   :  { %v179_v8 = vpop.xlane.xlu2 %178 }
 0x1c8   :  { %v892_v9 = vmul.f32 0.03125, %v179_v8 }
 0x1c9   :  { %v204_v10 = vpop.xlane.xlu1 %203 }
 0x1ca   :  { %v222_v11 = vmul.f32 %v892_v9, %v892_v9  ;;  %v217_v12 = vmul.f32 0.03125, %v204_v10 }
 0x1cc   :  { %v227_v13 = vsub.f32 %v217_v12, %v222_v11  ;;  %v232_v11 = vsub.f32 %v827_v38, %v892_v9 }
 0x1ce   :  { %v237_v14 = vadd.f32 1e-05, %v227_v13  ;;  %v191_v15 = vpop.xlane.xlu0 %190 }
 0x1cf   :  { %v196_v16 = vmul.f32 0.03125, %v191_v15  ;;  %v185_v17 = vpop.xlane.xlu2 %184 }
 0x1d0   :  { %670 = vrsqrt.f32 %v237_v14  ;;  %v896_v21 = vmul.f32 0.03125, %v185_v17  ;;  %vm248_vm7 = vweird.f32 %v237_v14 }
 0x1d1   :  { %v226_v18 = vmul.f32 %v196_v16, %v196_v16  ;;  %v216_v19 = vpop.xlane.xlu1 %215  ;;  %v236_v63 = vsub.f32 %v836_v43, %v196_v16 }
 0x1d2   :  { %v221_v20 = vmul.f32 0.03125, %v216_v19  ;;  %v224_v27 = vmul.f32 %v896_v21, %v896_v21  ;;  %v234_v43 = vsub.f32 %v834_v42, %v896_v21 }
 0x1d4   :  { %v231_v22 = vsub.f32 %v221_v20, %v226_v18 }
 0x1d6   :  { %v671_v23 = vpop.eup %670  ;;  %v241_v24 = vadd.f32 1e-05, %v231_v22  ;;  %v210_v25 = vpop.xlane.xlu0 %209 }
 0x1d7   :  { %v243_v26 = vmul.f32 %v671_v23, %v237_v14  ;;  %v219_v28 = vmul.f32 0.03125, %v210_v25  ;;  %v207_v29 = vpop.xlane.xlu2 %206  ;;  %vm249_vm5 = vweird.f32 %v671_v23 }
 0x1d8   :  { %672 = vrsqrt.f32 %v241_v24  ;;  %v218_v46 = vmul.f32 0.03125, %v207_v29  ;;  %vm288_vm8 = vweird.f32 %v241_v24  ;;  %vm250_vm9 = vmor %vm248_vm7, %vm249_vm5  ;;  %vm472_vm7 = vcmask 257024  }
 0x1d9   :  { %v244_v30 = vmul.f32 %v671_v23, %v243_v26  ;;  %v229_v31 = vsub.f32 %v219_v28, %v224_v27  ;;  %v213_v37 = vpop.xlane.xlu1 %212 }
 0x1da   :  { %v220_v49 = vmul.f32 0.03125, %v213_v37 }
 0x1db   :  { %v239_v32 = vadd.f32 1e-05, %v229_v31  ;;  %v245_v33 = vmul.f32 0.5, %v244_v30 }
 0x1dd   :  { %674 = vrsqrt.f32 %v239_v32  ;;  %v246_v44 = vsub.f32 1.5, %v245_v33  ;;  %vm268_vm12 = vweird.f32 %v239_v32 }
 0x1de   :  { %v673_v34 = vpop.eup %672  ;;  %v182_v35 = vpop.xlane.xlu0 %181 }
 0x1df   :  { %v283_v36 = vmul.f32 %v673_v34, %v241_v24  ;;  %v900_v39 = vmul.f32 0.03125, %v182_v35  ;;  %v188_v40 = vpop.xlane.xlu2 %187  ;;  %vm289_vm6 = vweird.f32 %v673_v34  ;;  %v247_v59 = vmul.f32 %v671_v23, %v246_v44 }
 0x1e0   :  { %v902_v41 = vmul.f32 0.03125, %v188_v40  ;;  %vm290_vm10 = vmor %vm288_vm8, %vm289_vm6 }
 0x1e1   :  { %v284_v45 = vmul.f32 %v673_v34, %v283_v36  ;;  %v223_v48 = vmul.f32 %v900_v39, %v900_v39  ;;  %v251_v10 = vsel %vm250_vm9, %v671_v23, %v247_v59  ;;  %v233_v33 = vsub.f32 %v844_v47, %v900_v39 }
 0x1e2   :  { %v225_v50 = vmul.f32 %v902_v41, %v902_v41  ;;  %v292_v17 = vmul.f32 %v251_v10, %v232_v11  ;;  %v235_v35 = vsub.f32 %v851_v51, %v902_v41 }
 0x1e3   :  { %v675_v52 = vpop.eup %674  ;;  %v285_v53 = vmul.f32 0.5, %v284_v45  ;;  %v228_v54 = vsub.f32 %v218_v46, %v223_v48 }
 0x1e4   :  { %v263_v55 = vmul.f32 %v675_v52, %v239_v32  ;;  %v230_v56 = vsub.f32 %v220_v49, %v225_v50  ;;  %vm269_vm11 = vweird.f32 %v675_v52 }
 0x1e5   :  { %v286_v57 = vsub.f32 1.5, %v285_v53  ;;  %v238_v58 = vadd.f32 1e-05, %v228_v54  ;;  %vm270_vm13 = vmor %vm268_vm12, %vm269_vm11 }
 0x1e6   :  { %v264_v60 = vmul.f32 %v675_v52, %v263_v55  ;;  %v240_v61 = vadd.f32 1e-05, %v230_v56 }
 0x1e7   :  { %v287_v62 = vmul.f32 %v673_v34, %v286_v57  ;;  %676 = vrsqrt.f32 %v238_v58  ;;  %vm258_vm1 = vweird.f32 %v238_v58  ;;  %v345_v50 = vpop.permute.xlu2 %344 }
 0x1e8   :  { %v265_v0 = vmul.f32 0.5, %v264_v60  ;;  %678 = vrsqrt.f32 %v240_v61  ;;  %vm278_vm2 = vweird.f32 %v240_v61 }
 0x1e9   :  { %v291_v8 = vsel %vm290_vm10, %v673_v34, %v287_v62 }
 0x1ea   :  { %v296_v12 = vmul.f32 %v291_v8, %v236_v63  ;;  %v266_v13 = vsub.f32 1.5, %v265_v0 }
 0x1ec   :  { %v331_v14 = vmul.f32 %v890_v7, %v296_v12  ;;  %v267_v15 = vmul.f32 %v675_v52, %v266_v13  ;;  %v327_v7 = vmul.f32 %v886_v5, %v292_v17 }
 0x1ed   :  { %v677_v18 = vpop.eup %676 }
 0x1ee   :  { %v679_v16 = vpop.eup %678  ;;  %v915_v19 = vadd.f32 %v880_v2, %v331_v14  ;;  %v271_v20 = vsel %vm270_vm13, %v675_v52, %v267_v15  ;;  %v253_v22 = vmul.f32 %v677_v18, %v238_v58  ;;  %vm259_vm14 = vweird.f32 %v677_v18 }
 0x1ef   :  { %v294_v38 = vmul.f32 %v271_v20, %v234_v43  ;;  %v273_v9 = vmul.f32 %v679_v16, %v240_v61  ;;  %vm279_vm15 = vweird.f32 %v679_v16  ;;  %vm260_vm3 = vmor %vm258_vm1, %vm259_vm14 }
 0x1f0   :  { %v628_v23 = vmul.f32 -1.442695, %v915_v19  ;;  %v254_v24 = vmul.f32 %v677_v18, %v253_v22  ;;  %vm280_vm5 = vmor %vm278_vm2, %vm279_vm15 }
 0x1f1   :  { %v329_v25 = vmul.f32 %v878_v1, %v294_v38  ;;  %v274_v26 = vmul.f32 %v679_v16, %v273_v9  ;;  %v310_v27 = vpop.permute.xlu0 %309  ;;  %v340_v28 = vpop.permute.xlu1 %339 }
 0x1f2   :  { %680 = vpow2.f32 %v628_v23  ;;  %v255_v42 = vmul.f32 0.5, %v254_v24  ;;  %v920_v21 = vadd.f32 %v340_v28, %v327_v7 }
 0x1f3   :  { %v923_v2 = vadd.f32 %v882_v3, %v329_v25  ;;  %v275_v29 = vmul.f32 0.5, %v274_v26 }
 0x1f4   :  { %v256_v30 = vsub.f32 1.5, %v255_v42  ;;  %v624_v31 = vmul.f32 -1.442695, %v920_v21 }
 0x1f5   :  { %v626_v32 = vmul.f32 -1.442695, %v923_v2  ;;  %v276_v5 = vsub.f32 1.5, %v275_v29 }
 0x1f6   :  { %v257_v1 = vmul.f32 %v677_v18, %v256_v30  ;;  %682 = vpow2.f32 %v624_v31 }
 0x1f7   :  { %684 = vpow2.f32 %v626_v32  ;;  %v277_v34 = vmul.f32 %v679_v16, %v276_v5 }
 0x1f8   :  { %v681_v3 = vpop.eup %680  ;;  %v261_v36 = vsel %vm260_vm3, %v677_v18, %v257_v1 }
 0x1f9   :  { %v386_v37 = vadd.f32 1.0, %v681_v3  ;;  %v281_v40 = vsel %vm280_vm5, %v679_v16, %v277_v34  ;;  %v293_v44 = vmul.f32 %v261_v36, %v233_v33  ;;  %v482_v45 = vpop.permute.xlu0 %481  ;;  %vm513_vm5 = vcmask 1045504  }
 0x1fa   :  { %v295_v46 = vmul.f32 %v281_v40, %v235_v35  ;;  %484 = vst.msk [vmem:[#allocation3 + $0x14] sm:$0x3] %vm29_vm0, %v482_v45 }
 0x1fb   :  { %686 = vrcp.f32 %v386_v37  ;;  %v328_v39 = vmul.f32 %v310_v27, %v293_v44  ;;  %v456_v59 = vand.u32 2147483647, %v386_v37  ;;  %v458_v60 = vand.u32 2147483648, %v386_v37 }
 0x1fc   :  { %v683_v48 = vpop.eup %682  ;;  %v330_v47 = vmul.f32 %v884_v4, %v295_v46  ;;  %vm452_vm6 = vweird.f32 %v386_v37 }
 0x1fd   :  { %v685_v49 = vpop.eup %684  ;;  %v382_v52 = vadd.f32 1.0, %v683_v48  ;;  %v936_v41 = vadd.f32 %v345_v50, %v328_v39  ;;  %vm457_vm9 = vcmp.eq.f32.partialorder %v456_v59, 8.507059e+37  ;;  %v459_v11 = vor.u32 1.1754944e-38, %v458_v60 }
 0x1fe   :  { %v384_v53 = vadd.f32 1.0, %v685_v49  ;;  %v934_v51 = vadd.f32 %v888_v6, %v330_v47 }
 0x1ff   :  { %688 = vrcp.f32 %v382_v52  ;;  %v625_v56 = vmul.f32 -1.442695, %v936_v41  ;;  %v396_v9 = vand.u32 2147483647, %v382_v52  ;;  %v398_v23 = vand.u32 2147483648, %v382_v52 }
 0x200   :  { %690 = vrcp.f32 %v384_v53  ;;  %v627_v55 = vmul.f32 -1.442695, %v934_v51  ;;  %v426_v13 = vand.u32 2147483647, %v384_v53  ;;  %v428_v17 = vand.u32 2147483648, %v384_v53 }
 0x201   :  { %v687_v54 = vpop.eup %686  ;;  %vm422_vm11 = vweird.f32 %v384_v53  ;;  %vm392_vm15 = vweird.f32 %v382_v52  ;;  %vm397_vm2 = vcmp.eq.f32.partialorder %v396_v9, 8.507059e+37  ;;  %v649_v36 = vld [vmem:[#allocation3 + $0x10] sm:$0x30] }
 0x202   :  { %v448_v57 = vmul.f32 %v687_v54, %v386_v37  ;;  %692 = vpow2.f32 %v627_v55  ;;  %vm453_vm0 = vweird.f32 %v687_v54  ;;  %v429_v25 = vor.u32 1.1754944e-38, %v428_v17 }
 0x203   :  { %694 = vpow2.f32 %v625_v56  ;;  %vm454_vm8 = vmor %vm452_vm6, %vm453_vm0  ;;  %vm427_vm14 = vcmp.eq.f32.partialorder %v426_v13, 8.507059e+37 }
 0x204   :  { %v449_v4 = vsub.f32 1.0, %v448_v57 }
 0x205   :  { %v689_v58 = vpop.eup %688 }
 0x206   :  { %v691_v61 = vpop.eup %690  ;;  %v450_v62 = vmul.f32 %v687_v54, %v449_v4  ;;  %v388_v6 = vmul.f32 %v689_v58, %v382_v52  ;;  %vm393_vm12 = vweird.f32 %v689_v58 }
 0x207   :  { %v418_v63 = vmul.f32 %v691_v61, %v384_v53  ;;  %vm423_vm10 = vweird.f32 %v691_v61  ;;  %vm394_vm1 = vmor %vm392_vm15, %vm393_vm12 }
 0x208   :  { %v451_v0 = vadd.f32 %v687_v54, %v450_v62  ;;  %v389_v8 = vsub.f32 1.0, %v388_v6  ;;  %v693_v10 = vpop.eup %692  ;;  %vm424_vm13 = vmor %vm422_vm11, %vm423_vm10  ;;  %v485_v6 = vld [vmem:[%s971_s4] sm:$0xf]  ;;  %s742_s4 = smov [#allocation4]  }
 0x209   :  { %v419_v12 = vsub.f32 1.0, %v418_v63  ;;  %v695_v14 = vpop.eup %694  ;;  %v385_v18 = vadd.f32 1.0, %v693_v10  ;;  %s594_s6 = sshll.u32 %s742_s4, 4  ;;  %s595_s6 = int_to_ptr.vmem [resolvable:$true] %s594_s6 }
 0x20a   :  { %v455_v15 = vsel %vm454_vm8, %v687_v54, %v451_v0  ;;  %v940_v20 = vadd.f32 1.0, %v695_v14  ;;  %v390_v22 = vmul.f32 %v689_v58, %v389_v8 }
 0x20b   :  { %v460_v43 = vsel %vm457_vm9, %v459_v11, %v455_v15  ;;  %v420_v16 = vmul.f32 %v691_v61, %v419_v12  ;;  %696 = vrcp.f32 %v385_v18  ;;  %v441_v37 = vand.u32 2147483647, %v385_v18 }
 0x20c   :  { %v466_v38 = vmul.f32 %v460_v43, %v915_v19  ;;  %698 = vrcp.f32 %v940_v20  ;;  %v391_v27 = vadd.f32 %v689_v58, %v390_v22  ;;  %v399_v19 = vor.u32 1.1754944e-38, %v398_v23 }
 0x20d   :  { %v421_v24 = vadd.f32 %v691_v61, %v420_v16  ;;  %v443_v40 = vand.u32 2147483648, %v385_v18  ;;  %v413_v45 = vand.u32 2147483648, %v940_v20  ;;  %vm437_vm6 = vweird.f32 %v385_v18 }
 0x20e   :  { %v471_v7 = vpack.c.bf16 %v466_v38, %v466_v38  ;;  %v395_v29 = vsel %vm394_vm1, %v689_v58, %v391_v27  ;;  %vm407_vm9 = vweird.f32 %v940_v20  ;;  %vm442_vm10 = vcmp.eq.f32.partialorder %v441_v37, 8.507059e+37 }
 0x20f   :  { %v425_v26 = vsel %vm424_vm13, %v691_v61, %v421_v24  ;;  %v400_v31 = vsel %vm397_vm2, %v399_v19, %v395_v29  ;;  %v444_v49 = vor.u32 1.1754944e-38, %v443_v40  ;;  %v414_v54 = vor.u32 1.1754944e-38, %v413_v45 }
 0x210   :  { %v430_v28 = vsel %vm427_vm14, %v429_v25, %v425_v26  ;;  %477 = vst.msk [vmem:[#allocation3 + $0x10] sm:$0xf] %vm472_vm7, %v471_v7  ;;  %v462_v33 = vmul.f32 %v400_v31, %v920_v21  ;;  %v411_v21 = vand.u32 2147483647, %v940_v20  ;;  %vm509_vm13 = vcmask 359424  }
 0x211   :  { %v464_v42 = vmul.f32 %v430_v28, %v923_v2  ;;  %v697_v30 = vpop.eup %696 }
 0x212   :  { %v699_v32 = vpop.eup %698  ;;  %v433_v1 = vmul.f32 %v697_v30, %v385_v18  ;;  %v467_v35 = vpack.c.bf16 %v462_v33, %v462_v33  ;;  %vm438_vm3 = vweird.f32 %v697_v30  ;;  %vm412_vm12 = vcmp.eq.f32.partialorder %v411_v21, 8.507059e+37 }
 0x213   :  { %v469_v5 = vpack.c.bf16 %v464_v42, %v464_v42  ;;  %v403_v34 = vmul.f32 %v699_v32, %v940_v20  ;;  %vm408_vm0 = vweird.f32 %v699_v32  ;;  %vm439_vm8 = vmor %vm437_vm6, %vm438_vm3  ;;  %v558_v20 = vpop.permute.xlu0 %557 }
 0x214   :  { %v434_v3 = vsub.f32 1.0, %v433_v1  ;;  %473 = vst.msk [vmem:[#allocation3] sm:$0xf] %vm472_vm7, %v467_v35  ;;  %vm409_vm11 = vmor %vm407_vm9, %vm408_vm0 }
 0x215   :  { %475 = vst.msk [vmem:[#allocation3 + $0x8] sm:$0xf] %vm472_vm7, %v469_v5  ;;  %v404_v44 = vsub.f32 1.0, %v403_v34 }
 0x216   :  { %v435_v2 = vmul.f32 %v697_v30, %v434_v3 }
 0x217   :  { %v639_v46 = vld [vmem:[#allocation3 + $0x10] sm:$0xf]  ;;  %v405_v48 = vmul.f32 %v699_v32, %v404_v44 }
 0x218   :  { %v640_v47 = vor.u32 %v649_v36, %v639_v46  ;;  %v436_v39 = vadd.f32 %v697_v30, %v435_v2 }
 0x219   :  { %v406_v50 = vadd.f32 %v699_v32, %v405_v48 }
 0x21a   :  { %v515_v52 = vsel %vm513_vm5, %v640_v47, 0  ;;  %v440_v53 = vsel %vm439_vm8, %v697_v30, %v436_v39 }
 0x21b   :  { %522 = vmatpush.bf16.msra.mxu1 %v515_v52  ;;  %v445_v55 = vsel %vm442_vm10, %v444_v49, %v440_v53  ;;  %v410_v56 = vsel %vm409_vm11, %v699_v32, %v406_v50  ;;  %v565_v26 = vpop.permute.xlu0 %564 }
 0x21c   :  { %v465_v57 = vmul.f32 %v445_v55, %v934_v51  ;;  %v415_v4 = vsel %vm412_vm12, %v414_v54, %v410_v56 }
 0x21d   :  { %v463_v58 = vmul.f32 %v415_v4, %v936_v41 }
 0x21e   :  { %v470_v59 = vpack.c.bf16 %v465_v57, %v465_v57 }
 0x21f   :  { %v468_v60 = vpack.c.bf16 %v463_v58, %v463_v58 }
 0x220   :  { %476 = vst.msk [vmem:[#allocation3 + $0xc] sm:$0xf] %vm472_vm7, %v470_v59 }
 0x221   :  { %474 = vst.msk [vmem:[#allocation3 + $0x4] sm:$0xf] %vm472_vm7, %v468_v60 }
 0x227   :  { %v648_v61 = vld [vmem:[#allocation3 + $0x8] sm:$0xff] }
 0x228   :  { %523 = vmatpush.bf16.msra.mxu1 %v648_v61  ;;  %v647_v62 = vld [vmem:[#allocation3] sm:$0xff] }
 0x22c   :  { %524 = vmatpush.bf16.msra.mxu1 %v647_v62 }
 0x22f   :  { %641 = vmatmul.msk.bf16.vlgmr.msra.gmra.mxu1 %vm509_vm13, %v485_v6 }
 0x2ac   :  { %v526_v51 = vpop.f32.mrf.mxu1 }
 0x2ad   :  { %v530_v63 = vsel %vm176_vm4, %v526_v51, 0.0  ;;  %v534_v41 = vmul.f32 %v526_v51, %v526_v51 }
 0x2ae   :  { %531 = vadd.xlane.f32.xlu1 %v530_v63 }
 0x2af   :  { %v535_v0 = vsel %vm176_vm4, %v534_v41, 0.0 }
 0x2b0   :  { %536 = vadd.xlane.f32.xlu2 %v535_v0 }
 0x2b4   :  { %v528_v8 = vpop.f32.mrf.mxu1 }
 0x321   :  { %v532_v10 = vpop.xlane.xlu1 %531 }
 0x322   :  { %v533_v11 = vmul.f32 0.03125, %v532_v10 }
 0x323   :  { %v537_v12 = vpop.xlane.xlu2 %536 }
 0x324   :  { %v539_v13 = vmul.f32 %v533_v11, %v533_v11  ;;  %v538_v14 = vmul.f32 0.03125, %v537_v12  ;;  %v541_v23 = vsub.f32 %v526_v51, %v533_v11 }
 0x326   :  { %v540_v15 = vsub.f32 %v538_v14, %v539_v13 }
 0x328   :  { %v542_v17 = vadd.f32 1e-05, %v540_v15 }
 0x32a   :  { %700 = vrsqrt.f32 %v542_v17  ;;  %vm549_vm14 = vweird.f32 %v542_v17 }
 0x330   :  { %v701_v18 = vpop.eup %700 }
 0x331   :  { %v544_v43 = vmul.f32 %v701_v18, %v542_v17  ;;  %vm550_vm7 = vweird.f32 %v701_v18 }
 0x332   :  { %vm551_vm15 = vmor %vm549_vm14, %vm550_vm7 }
 0x333   :  { %v545_v16 = vmul.f32 %v701_v18, %v544_v43 }
 0x335   :  { %v546_v22 = vmul.f32 0.5, %v545_v16 }
 0x337   :  { %v547_v38 = vsub.f32 1.5, %v546_v22 }
 0x339   :  { %v548_v9 = vmul.f32 %v701_v18, %v547_v38 }
 0x33b   :  { %v552_v24 = vsel %vm551_vm15, %v701_v18, %v548_v9 }
 0x33c   :  { %v553_v7 = vmul.f32 %v552_v24, %v541_v23 }
 0x33e   :  { %v560_v25 = vmul.f32 %v558_v20, %v553_v7 }
 0x340   :  { %v567_v27 = vadd.f32 %v565_v26, %v560_v25 }
 0x342   :  { %v642_v28 = vmul.f32 -1.442695, %v567_v27 }
 0x344   :  { %702 = vpow2.f32 %v642_v28 }
 0x34a   :  { %v703_v19 = vpop.eup %702 }
 0x34b   :  { %v571_v42 = vadd.f32 1.0, %v703_v19 }
 0x34d   :  { %704 = vrcp.f32 %v571_v42  ;;  %v583_v32 = vand.u32 2147483648, %v571_v42  ;;  %v581_v1 = vand.u32 2147483647, %v571_v42  ;;  %vm577_vm2 = vweird.f32 %v571_v42 }
 0x34f   :  { %v584_v34 = vor.u32 1.1754944e-38, %v583_v32  ;;  %vm582_vm5 = vcmp.eq.f32.partialorder %v581_v1, 8.507059e+37 }
 0x353   :  { %v705_v29 = vpop.eup %704 }
 0x354   :  { %v573_v30 = vmul.f32 %v705_v29, %v571_v42  ;;  %vm578_vm1 = vweird.f32 %v705_v29 }
 0x355   :  { %vm579_vm3 = vmor %vm577_vm2, %vm578_vm1 }
 0x356   :  { %v574_v31 = vsub.f32 1.0, %v573_v30 }
 0x358   :  { %v575_v5 = vmul.f32 %v705_v29, %v574_v31 }
 0x35a   :  { %v576_v33 = vadd.f32 %v705_v29, %v575_v5 }
 0x35c   :  { %v580_v3 = vsel %vm579_vm3, %v705_v29, %v576_v33 }
 0x35d   :  { %v585_v35 = vsel %vm582_vm5, %v584_v34, %v580_v3 }
 0x35e   :  { %v587_v36 = vmul.f32 %v585_v35, %v567_v27 }
 0x360   :  { %588 = vst.msk [vmem:[#allocation4] sm:$0xff] %vm176_vm4, %v587_v36 }
 0x361   :  { %599 = dma.vmem_to_hbm [thread:$0]  %s595_s6, 128, %s597_s17, [#allocation5]  }
 0x362   :  { %730 = dma.done.wait [#allocation5], 128  }
 0x363   :  { %731 = vsyncadd [#allocation5], 4294967168 }
 0x364   :  { %604 = vsyncpa [#allocation5], 1 }

</bundles_post_ra>
